<compile_context>
chip_gen: v7x
topology: tpu7x:2x2x1
jax: 0.10.0
libtpu: 0.0.40
codegen_flags: <defaults>
</compile_context>

<pallas_src>
import jax
import jax.numpy as jnp
from jax.experimental import pallas as pl
from jax.experimental.pallas import tpu as pltpu


def _round_up(x, m):
    return ((x + m - 1) // m) * m


def _block_diag_t(w, reps):
    """w: (out_dim, in_dim) PyTorch nn.Linear weight.

    Returns the (reps*in_dim, reps*out_dim) block-diagonal matrix whose
    diagonal blocks are w^T, so a packed row [x_0 | x_1 | ... | x_{reps-1}]
    (each x_i of length in_dim) times it yields [x_0 w^T | ... | x_{reps-1} w^T].
    """
    out_dim, in_dim = w.shape
    eye = jnp.eye(reps, dtype=w.dtype)
    bd = jnp.einsum("ij,nk->ikjn", eye, w)          # [i,k,j,n] = (i==j) * w[n,k]
    return bd.reshape(reps * in_dim, reps * out_dim)


def decoder_kernel(z_ref, w1_ref, b1_ref, w2_ref, b2_ref, out_ref):
    # z_ref:  (TR, pack*h2)          batch rows packed 8-per-row along lanes
    # w1_ref: (pack*h2, pack*hid)    block-diagonal W1^T (resident in VMEM)
    # b1_ref: (1, pack*hid)
    # w2_ref: (pack*hid, pack*in)    block-diagonal W2^T (resident in VMEM)
    # b2_ref: (1, pack*in)
    # out_ref:(TR, pack*in)
    h = jnp.dot(z_ref[...], w1_ref[...], preferred_element_type=jnp.float32)
    h = jnp.maximum(h + b1_ref[...], 0.0)
    y = jnp.dot(h, w2_ref[...], preferred_element_type=jnp.float32)
    y = jnp.maximum(y + b2_ref[...], 0.0)
    out_ref[...] = y.astype(out_ref.dtype)


def decoder_forward(z, w1, b1, w2, b2, *, tb_cap=8192):
    """z: (B, hidden_dim_2). w1: (hidden_dim, hidden_dim_2),
    w2: (input_dim, hidden_dim) -- PyTorch nn.Linear weight layout.
    Returns (B, input_dim)."""
    B, h2 = z.shape
    hidden = w1.shape[0]
    in_dim = w2.shape[0]

    # Pack 8 consecutive batch rows along the lane axis so the kernel's
    # loads/stores are lane-dense (the unpacked output is only in_dim < 128
    # lanes wide -> masked vst on every store).  Fall back to no packing if
    # the widened block-diagonal weights would get large (big layer dims) or
    # the output is already lane-dense.
    pack = 8
    widened_weight_elems = (pack * h2) * (pack * hidden) + (pack * hidden) * (pack * in_dim)
    if in_dim >= 128 or widened_weight_elems > (2 << 20):   # > 8 MiB of f32
        pack = 1

    B_pad = _round_up(B, pack)
    if B_pad != B:
        z = jnp.pad(z, ((0, B_pad - B), (0, 0)))

    # Batch tile (in logical rows): whole batch when small; otherwise cap the
    # tile (2048-8192 range) and keep >= 2 grid steps so the "parallel" axis
    # can shard across both v7x TensorCores.
    if B_pad <= 1024:
        tb = B_pad
    else:
        tb = min(tb_cap, _round_up(pl.cdiv(B_pad, 2), 8 * pack))
    rows, trows = B_pad // pack, tb // pack
    grid = (pl.cdiv(rows, trows),)

    # Free row-major view: (B_pad, h2) -> (rows, pack*h2).
    z_wide = z.reshape(rows, pack * h2)
    # One-time (per call) widened parameters; small, and resident in VMEM
    # across the whole grid (constant index_maps).
    w1_bd = _block_diag_t(w1, pack)                       # (pack*h2,     pack*hidden)
    w2_bd = _block_diag_t(w2, pack)                       # (pack*hidden, pack*in_dim)
    b1_w = jnp.tile(b1, pack).reshape(1, pack * hidden)
    b2_w = jnp.tile(b2, pack).reshape(1, pack * in_dim)

    flops = (2 * rows * (pack * h2) * (pack * hidden)
             + 2 * rows * (pack * hidden) * (pack * in_dim))
    bytes_accessed = 4 * (z_wide.size + w1_bd.size + b1_w.size + w2_bd.size
                          + b2_w.size + rows * pack * in_dim)

    out_wide = pl.pallas_call(
        decoder_kernel,
        out_shape=jax.ShapeDtypeStruct((rows, pack * in_dim), z.dtype),
        grid=grid,
        in_specs=[
            # activations: tiled over the batch grid axis, lane-dense
            pl.BlockSpec((trows, pack * h2), lambda i: (i, 0)),
            # weights / biases: constant index_map -> resident in VMEM
            pl.BlockSpec((pack * h2, pack * hidden), lambda i: (0, 0)),
            pl.BlockSpec((1, pack * hidden), lambda i: (0, 0)),
            pl.BlockSpec((pack * hidden, pack * in_dim), lambda i: (0, 0)),
            pl.BlockSpec((1, pack * in_dim), lambda i: (0, 0)),
        ],
        out_specs=pl.BlockSpec((trows, pack * in_dim), lambda i: (i, 0)),
        compiler_params=pltpu.CompilerParams(
            dimension_semantics=("parallel",),
            vmem_limit_bytes=32 * 1024 * 1024),
        cost_estimate=pl.CostEstimate(
            flops=flops, transcendentals=0, bytes_accessed=bytes_accessed),
    )(z_wide, w1_bd, b1_w, w2_bd, b2_w)

    out = out_wide.reshape(B_pad, in_dim)     # free row-major view back
    return out if B_pad == B else out[:B]


def reference_forward(z, w1, b1, w2, b2):
    h = jnp.maximum(z @ w1.T + b1, 0.0)
    return jnp.maximum(h @ w2.T + b2, 0.0)


if __name__ == "__main__":
    # Small shapes consistent with Decoder(input_dim, hidden_dim, hidden_dim_2).
    input_dim, hidden_dim, hidden_dim_2 = 16, 64, 32
    B = 8

    key = jax.random.PRNGKey(0)
    kz, k1, k2, k3, k4 = jax.random.split(key, 5)

    z = jax.random.normal(kz, (B, hidden_dim_2), dtype=jnp.float32)

    # Deterministic parameter init (uniform, roughly matching nn.Linear's scale).
    bound1 = 1.0 / jnp.sqrt(hidden_dim_2)
    w1 = jax.random.uniform(k1, (hidden_dim, hidden_dim_2),
                            minval=-bound1, maxval=bound1, dtype=jnp.float32)
    b1 = jax.random.uniform(k2, (hidden_dim,),
                            minval=-bound1, maxval=bound1, dtype=jnp.float32)

    bound2 = 1.0 / jnp.sqrt(hidden_dim)
    w2 = jax.random.uniform(k3, (input_dim, hidden_dim),
                            minval=-bound2, maxval=bound2, dtype=jnp.float32)
    b2 = jax.random.uniform(k4, (input_dim,),
                            minval=-bound2, maxval=bound2, dtype=jnp.float32)

    out = decoder_forward(z, w1, b1, w2, b2)
    out = jax.block_until_ready(out)

    ref = reference_forward(z, w1, b1, w2, b2)
    assert out.shape == (B, input_dim)
    # Both the kernel and the XLA reference run their matmuls on the MXU at
    # default precision (bf16 passes, f32 accumulation), so allow a small tol.
    assert jnp.allclose(out, ref, atol=2e-2, rtol=2e-2), "mismatch vs reference"

    print("KERNEL_OK")
</pallas_src>

<mosaic_0001>
module attributes {stable_mosaic.version = 11 : i64} {
  func.func @decoder_kernel(%arg0: i32, %arg1: memref<1x256xf32, #tpu.memory_space<vmem>>, %arg2: memref<256x512xf32, #tpu.memory_space<vmem>>, %arg3: memref<1x512xf32, #tpu.memory_space<vmem>>, %arg4: memref<512x128xf32, #tpu.memory_space<vmem>>, %arg5: memref<1x128xf32, #tpu.memory_space<vmem>>, %arg6: memref<1x128xf32, #tpu.memory_space<vmem>>) attributes {dimension_semantics = [#tpu.dimension_semantics<parallel>], iteration_bounds = array<i64: 1>, scalar_prefetch = 0 : i64, scratch_operands = 0 : i64, tpu.core_type = #tpu.core_type<tc>, window_params = [{transform_indices = @transform_0, window_bounds = array<i64: 1, 256>}, {pipeline_mode = #tpu.pipeline_mode<synchronous>, transform_indices = @transform_1, window_bounds = array<i64: 256, 512>}, {pipeline_mode = #tpu.pipeline_mode<synchronous>, transform_indices = @transform_2, window_bounds = array<i64: 1, 512>}, {pipeline_mode = #tpu.pipeline_mode<synchronous>, transform_indices = @transform_3, window_bounds = array<i64: 512, 128>}, {pipeline_mode = #tpu.pipeline_mode<synchronous>, transform_indices = @transform_4, window_bounds = array<i64: 1, 128>}, {transform_indices = @transform_5, window_bounds = array<i64: 1, 128>}]} {
    %c0 = arith.constant 0 : index
    %c0_0 = arith.constant 0 : index
    %0 = vector.load %arg1[%c0, %c0_0] : memref<1x256xf32, #tpu.memory_space<vmem>>, vector<1x256xf32>
    %c0_1 = arith.constant 0 : index
    %c0_2 = arith.constant 0 : index
    %1 = vector.load %arg2[%c0_1, %c0_2] : memref<256x512xf32, #tpu.memory_space<vmem>>, vector<256x512xf32>
    %cst = arith.constant dense<0.000000e+00> : vector<1x512xf32>
    %2 = tpu.matmul %0, %1, %cst {dimension_numbers = #tpu.dot_dimension_numbers<[1], [0], [0], [1], [0, 0, 1, 1], [], []>} : vector<1x256xf32>, vector<256x512xf32>, vector<1x512xf32> -> vector<1x512xf32>
    %c0_3 = arith.constant 0 : index
    %c0_4 = arith.constant 0 : index
    %3 = vector.load %arg3[%c0_3, %c0_4] : memref<1x512xf32, #tpu.memory_space<vmem>>, vector<1x512xf32>
    %4 = arith.addf %2, %3 : vector<1x512xf32>
    %cst_5 = arith.constant 0.000000e+00 : f32
    %5 = vector.broadcast %cst_5 : f32 to vector<1x512xf32>
    %6 = arith.maximumf %4, %5 : vector<1x512xf32>
    %c0_6 = arith.constant 0 : index
    %c0_7 = arith.constant 0 : index
    %7 = vector.load %arg4[%c0_6, %c0_7] : memref<512x128xf32, #tpu.memory_space<vmem>>, vector<512x128xf32>
    %cst_8 = arith.constant dense<0.000000e+00> : vector<1x128xf32>
    %8 = tpu.matmul %6, %7, %cst_8 {dimension_numbers = #tpu.dot_dimension_numbers<[1], [0], [0], [1], [0, 0, 1, 1], [], []>} : vector<1x512xf32>, vector<512x128xf32>, vector<1x128xf32> -> vector<1x128xf32>
    %c0_9 = arith.constant 0 : index
    %c0_10 = arith.constant 0 : index
    %9 = vector.load %arg5[%c0_9, %c0_10] : memref<1x128xf32, #tpu.memory_space<vmem>>, vector<1x128xf32>
    %10 = arith.addf %8, %9 : vector<1x128xf32>
    %cst_11 = arith.constant 0.000000e+00 : f32
    %11 = vector.broadcast %cst_11 : f32 to vector<1x128xf32>
    %12 = arith.maximumf %10, %11 : vector<1x128xf32>
    %c0_12 = arith.constant 0 : index
    %c0_13 = arith.constant 0 : index
    %13 = vector.load %arg6[%c0_12, %c0_13] : memref<1x128xf32, #tpu.memory_space<vmem>>, vector<1x128xf32>
    tpu.vector_store %arg6[%c0_12, %c0_13], %12 {strides = array<i32>} : memref<1x128xf32, #tpu.memory_space<vmem>>, vector<1x128xf32>,
    return
  }
  func.func @transform_0(%arg0: i32) -> (i32, i32) {
    %c0_i32 = arith.constant 0 : i32
    %c0_i32_0 = arith.constant 0 : i32
    return %arg0, %c0_i32 : i32, i32
  }
  func.func @transform_1(%arg0: i32) -> (i32, i32) {
    %c0_i32 = arith.constant 0 : i32
    %c0_i32_0 = arith.constant 0 : i32
    %c0_i32_1 = arith.constant 0 : i32
    return %c0_i32, %c0_i32_0 : i32, i32
  }
  func.func @transform_2(%arg0: i32) -> (i32, i32) {
    %c0_i32 = arith.constant 0 : i32
    %c0_i32_0 = arith.constant 0 : i32
    %c0_i32_1 = arith.constant 0 : i32
    return %c0_i32, %c0_i32_0 : i32, i32
  }
  func.func @transform_3(%arg0: i32) -> (i32, i32) {
    %c0_i32 = arith.constant 0 : i32
    %c0_i32_0 = arith.constant 0 : i32
    %c0_i32_1 = arith.constant 0 : i32
    return %c0_i32, %c0_i32_0 : i32, i32
  }
  func.func @transform_4(%arg0: i32) -> (i32, i32) {
    %c0_i32 = arith.constant 0 : i32
    %c0_i32_0 = arith.constant 0 : i32
    %c0_i32_1 = arith.constant 0 : i32
    return %c0_i32, %c0_i32_0 : i32, i32
  }
  func.func @transform_5(%arg0: i32) -> (i32, i32) {
    %c0_i32 = arith.constant 0 : i32
    %c0_i32_0 = arith.constant 0 : i32
    return %arg0, %c0_i32 : i32, i32
  }
}

</mosaic_0001>

<bundles_post_ra>
// kernel: tpu_custom_call.1
= control target key start
LH: loop header
LB: loop body
LE: loop exit
PB: predicated region body
PF: predicated region fallthrough
CT: control target
= control target key end

     0   :  { %10 = vsyncpa [#allocation3], 0  ;;  %s1065_s0 = inlined_call_operand.hbm [shape: f32[1,256], index: 0, kind: input, shape index: {}]   ;;  %s1066_s1 = inlined_call_operand.hbm [shape: f32[256,512], index: 1, kind: input, shape index: {}]   ;;  %s1067_s2 = inlined_call_operand.vmem [shape: f32[1,512], index: 2, kind: input, shape index: {}]   ;;  %s1068_s3 = inlined_call_operand.hbm [shape: f32[512,128], index: 3, kind: input, shape index: {}]   ;;  %s1069_s4 = inlined_call_operand.vmem [shape: f32[1,128], index: 4, kind: input, shape index: {}]   ;;  %s1070_s5 = inlined_call_operand.hbm [shape: f32[1,128], index: 5, kind: output, shape index: {}]  }
   0x1   :  { %11 = vsyncpa [#allocation6], 0 }
   0x2   :  { %12 = vsyncpa [#allocation4], 0  ;;  %s955_s18 = smov [#allocation5]   ;;  %s861_s22 = scalar_lea.hbm %s1066_s1, 16384 }
   0x3   :  { %s28_s19 = sshll.u32 %s955_s18, 4  ;;  %p862_p0 = scmp.ne.s32.totalorder %s1066_s1, %s861_s22  ;;  %s29_s19 = int_to_ptr.vmem [resolvable:$true] %s28_s19 }
   0x4   :  { %p865_p1 = scmp.lt.u32.totalorder %s861_s22, %s1066_s1 }
   0x6   :  { %p867_p2 = pnand %p865_p1, %p862_p0 }
   0x8   :  { %870 = shalt.err (!%p867_p2)
}
   0x9   :  { %s871_s27 = scalar_lea.vmem %s29_s19, 16384  ;;  %p876_p4 = scmp.lt.s32.totalorder %s29_s19, %s29_s19 }
   0xa   :  { %p872_p3 = scmp.ne.s32.totalorder %s29_s19, %s871_s27  ;;  %p877_p5 = scmp.lt.s32.totalorder %s871_s27, %s871_s27 }
   0xc   :  { %p878_p6 = por %p877_p5, %p876_p4 }
   0xe   :  { %p879_p7 = pnand %p878_p6, %p872_p3 }
  0x10   :  { %882 = shalt.err (!%p879_p7)
}
  0x11   :  { %s956_s28 = smov 512   ;;  %s957_s29 = smov 32  }
  0x12   :  { %34 = dma.hbm_to_vmem [thread:$0]  %s1066_s1, 16384, %s29_s19, [#allocation6], %s956_s28, %s956_s28, %s957_s29  }
  0x13   :  { %s958_s7 = smov [#allocation2]   ;;  %s959_s9 = smov [#allocation7]  }
  0x14   :  { %s19_s8 = sshll.u32 %s958_s7, 4  ;;  %s42_s10 = sshll.u32 %s959_s9, 4  ;;  %s20_s8 = int_to_ptr.vmem [resolvable:$true] %s19_s8  ;;  %s43_s10 = int_to_ptr.vmem [resolvable:$true] %s42_s10 }
  0x15   :  { %s883_s13 = scalar_lea.hbm %s1065_s0, 32 }
  0x16   :  { %p884_p8 = scmp.ne.s32.totalorder %s1065_s0, %s883_s13  ;;  %p887_p9 = scmp.lt.u32.totalorder %s883_s13, %s1065_s0 }
  0x18   :  { %p889_p10 = pnand %p887_p9, %p884_p8 }
  0x1a   :  { %892 = shalt.err (!%p889_p10)
}
  0x1b   :  { %s893_s1 = scalar_lea.vmem %s20_s8, 32  ;;  %p898_p12 = scmp.lt.s32.totalorder %s20_s8, %s20_s8 }
  0x1c   :  { %p894_p11 = scmp.ne.s32.totalorder %s20_s8, %s893_s1  ;;  %p899_p13 = scmp.lt.s32.totalorder %s893_s1, %s893_s1 }
  0x1e   :  { %p900_p0 = por %p899_p13, %p898_p12 }
  0x20   :  { %p901_p1 = pnand %p900_p0, %p894_p11 }
  0x22   :  { %904 = shalt.err (!%p901_p1)
}
  0x23   :  { %22 = dma.hbm_to_vmem [thread:$0]  %s1065_s0, 32, %s20_s8, [#allocation3]  }
  0x24   :  { %s905_s22 = scalar_lea.hbm %s1068_s3, 8192 }
  0x25   :  { %p906_p2 = scmp.ne.s32.totalorder %s1068_s3, %s905_s22  ;;  %p909_p3 = scmp.lt.u32.totalorder %s905_s22, %s1068_s3 }
  0x27   :  { %p911_p4 = pnand %p909_p3, %p906_p2 }
  0x29   :  { %914 = shalt.err (!%p911_p4)
}
  0x2a   :  { %s915_s27 = scalar_lea.vmem %s43_s10, 8192  ;;  %p920_p6 = scmp.lt.s32.totalorder %s43_s10, %s43_s10 }
  0x2b   :  { %p916_p5 = scmp.ne.s32.totalorder %s43_s10, %s915_s27  ;;  %p921_p7 = scmp.lt.s32.totalorder %s915_s27, %s915_s27 }
  0x2d   :  { %p922_p8 = por %p921_p7, %p920_p6 }
  0x2f   :  { %p923_p9 = pnand %p922_p8, %p916_p5 }
  0x31   :  { %926 = shalt.err (!%p923_p9)
}
  0x32   :  { %s960_s0 = smov 128   ;;  %s961_s28 = smov 8  }
  0x33   :  { %48 = dma.hbm_to_vmem [thread:$0]  %s1068_s3, 8192, %s43_s10, [#allocation6], %s960_s0, %s960_s0, %s961_s28  }
  0x34   :  { %949 = dma.done.wait [#allocation3], 32  }
  0x35   :  { %950 = vsyncadd [#allocation3], 4294967264 }
  0x36   :  { %951 = dma.done.wait [#allocation6], 24576  }
  0x37   :  { %952 = vsyncadd [#allocation6], 4294942720  ;;  %v62_v0 = vld [vmem:[#allocation5 + $0x8] sm:$0xff]  ;;  %v64_v2 = vld [vmem:[#allocation5 + $0x18] sm:$0xff]  ;;  %s962_s8 = smov [#allocation8]  }
  0x38   :  { %v66_v1 = vld [vmem:[#allocation5 + $0x28] sm:$0xff]  ;;  %v68_v4 = vld [vmem:[#allocation5 + $0x38] sm:$0xff]  ;;  %v61_v5 = vld [vmem:[#allocation5] sm:$0xff]  ;;  %s581_s9 = sshll.u32 %s962_s8, 4  ;;  %s582_s9 = int_to_ptr.vmem [resolvable:$true] %s581_s9 }
  0x39   :  { %v661_v3 = vpack.c.bf16 %v66_v1, %v62_v0  ;;  %v65_v6 = vld [vmem:[#allocation5 + $0x20] sm:$0xff]  ;;  %v725_v7 = vpack.c.bf16 %v68_v4, %v64_v2  ;;  %v63_v9 = vld [vmem:[#allocation5 + $0x10] sm:$0xff]  ;;  %v70_v11 = vld [vmem:[#allocation5 + $0x48] sm:$0xff]  ;;  %s927_s10 = scalar_lea.vmem %s582_s9, 16  ;;  %s931_s11 = scalar_lea.vmem %s582_s9, 32 }
  0x3a   :  { %v663_v8 = vpack.c.bf16 %v65_v6, %v61_v5  ;;  %v67_v10 = vld [vmem:[#allocation5 + $0x30] sm:$0xff]  ;;  %v74_v13 = vld [vmem:[#allocation5 + $0x68] sm:$0xff]  ;;  %v72_v14 = vld [vmem:[#allocation5 + $0x58] sm:$0xff]  ;;  %p928_p10 = scmp.ne.s32.totalorder %s582_s9, %s927_s10  ;;  %p932_p11 = scmp.lt.s32.totalorder %s582_s9, %s582_s9 }
  0x3b   :  { %662 = vmatprep.subr.bf16.mxu0 %v661_v3  ;;  %v727_v12 = vpack.c.bf16 %v67_v10, %v63_v9  ;;  %v76_v15 = vld [vmem:[#allocation5 + $0x78] sm:$0xff]  ;;  %726 = vmatprep.subr.bf16.mxu1 %v725_v7  ;;  %v665_v16 = vpack.c.bf16 %v74_v13, %v70_v11  ;;  %v69_v18 = vld [vmem:[#allocation5 + $0x40] sm:$0xff]  ;;  %v71_v20 = vld [vmem:[#allocation5 + $0x50] sm:$0xff]  ;;  %p933_p12 = scmp.lt.s32.totalorder %s931_s11, %s927_s10 }
  0x3c   :  { %664 = vmatpush1.bf16.msra.mxu0 %v663_v8  ;;  %v729_v17 = vpack.c.bf16 %v76_v15, %v72_v14  ;;  %v73_v19 = vld [vmem:[#allocation5 + $0x60] sm:$0xff]  ;;  %v75_v22 = vld [vmem:[#allocation5 + $0x70] sm:$0xff]  ;;  %v78_v23 = vld [vmem:[#allocation5 + $0x88] sm:$0xff] }
  0x3d   :  { %728 = vmatpush1.bf16.msra.mxu1 %v727_v12  ;;  %v667_v21 = vpack.c.bf16 %v73_v19, %v69_v18  ;;  %v82_v24 = vld [vmem:[#allocation5 + $0xa8] sm:$0xff]  ;;  %666 = vmatprep.subr.bf16.mxu0 %v665_v16  ;;  %v731_v25 = vpack.c.bf16 %v75_v22, %v71_v20  ;;  %v80_v27 = vld [vmem:[#allocation5 + $0x98] sm:$0xff]  ;;  %v77_v29 = vld [vmem:[#allocation5 + $0x80] sm:$0xff]  ;;  %p934_p13 = por %p933_p12, %p932_p11 }
  0x3e   :  { %730 = vmatprep.subr.bf16.mxu1 %v729_v17  ;;  %v669_v26 = vpack.c.bf16 %v82_v24, %v78_v23  ;;  %v84_v28 = vld [vmem:[#allocation5 + $0xb8] sm:$0xff]  ;;  %v81_v31 = vld [vmem:[#allocation5 + $0xa0] sm:$0xff]  ;;  %v79_v32 = vld [vmem:[#allocation5 + $0x90] sm:$0xff] }
  0x3f   :  { %v733_v30 = vpack.c.bf16 %v84_v28, %v80_v27  ;;  %v83_v33 = vld [vmem:[#allocation5 + $0xb0] sm:$0xff]  ;;  %v671_v34 = vpack.c.bf16 %v81_v31, %v77_v29  ;;  %v86_v35 = vld [vmem:[#allocation5 + $0xc8] sm:$0xff]  ;;  %v88_v37 = vld [vmem:[#allocation5 + $0xd8] sm:$0xff]  ;;  %p935_p0 = pnand %p934_p13, %p928_p10 }
  0x40   :  { %668 = vmatpush1.bf16.msra.mxu0 %v667_v21  ;;  %v90_v36 = vld [vmem:[#allocation5 + $0xe8] sm:$0xff]  ;;  %v735_v38 = vpack.c.bf16 %v83_v33, %v79_v32  ;;  %v92_v40 = vld [vmem:[#allocation5 + $0xf8] sm:$0xff]  ;;  %v85_v41 = vld [vmem:[#allocation5 + $0xc0] sm:$0xff] }
  0x41   :  { %732 = vmatpush1.bf16.msra.mxu1 %v731_v25  ;;  %670 = vmatprep.subr.bf16.mxu0 %v669_v26  ;;  %v673_v39 = vpack.c.bf16 %v90_v36, %v86_v35  ;;  %v89_v42 = vld [vmem:[#allocation5 + $0xe0] sm:$0xff]  ;;  %v737_v43 = vpack.c.bf16 %v92_v40, %v88_v37  ;;  %v87_v44 = vld [vmem:[#allocation5 + $0xd0] sm:$0xff]  ;;  %v94_v46 = vld [vmem:[#allocation5 + $0x108] sm:$0xff] }
  0x42   :  { %734 = vmatprep.subr.bf16.mxu1 %v733_v30  ;;  %v91_v45 = vld [vmem:[#allocation5 + $0xf0] sm:$0xff]  ;;  %v98_v47 = vld [vmem:[#allocation5 + $0x128] sm:$0xff]  ;;  %v96_v48 = vld [vmem:[#allocation5 + $0x118] sm:$0xff]  ;;  %v675_v50 = vpack.c.bf16 %v89_v42, %v85_v41 }
  0x43   :  { %v100_v49 = vld [vmem:[#allocation5 + $0x138] sm:$0xff]  ;;  %v739_v51 = vpack.c.bf16 %v91_v45, %v87_v44  ;;  %v677_v52 = vpack.c.bf16 %v98_v47, %v94_v46  ;;  %v93_v53 = vld [vmem:[#allocation5 + $0x100] sm:$0xff]  ;;  %v95_v55 = vld [vmem:[#allocation5 + $0x110] sm:$0xff]  ;;  %v191_v46 = vlaneseq }
  0x44   :  { %672 = vmatpush1.bf16.msra.mxu0 %v671_v34  ;;  %v97_v54 = vld [vmem:[#allocation5 + $0x120] sm:$0xff]  ;;  %v741_v56 = vpack.c.bf16 %v100_v49, %v96_v48  ;;  %v99_v57 = vld [vmem:[#allocation5 + $0x130] sm:$0xff]  ;;  %v102_v58 = vld [vmem:[#allocation5 + $0x148] sm:$0xff] }
  0x45   :  { %736 = vmatpush1.bf16.msra.mxu1 %v735_v38  ;;  %674 = vmatprep.subr.bf16.mxu0 %v673_v39  ;;  %v106_v59 = vld [vmem:[#allocation5 + $0x168] sm:$0xff]  ;;  %v104_v60 = vld [vmem:[#allocation5 + $0x158] sm:$0xff]  ;;  %v679_v62 = vpack.c.bf16 %v97_v54, %v93_v53  ;;  %v743_v63 = vpack.c.bf16 %v99_v57, %v95_v55  ;;  %v101_v1 = vld [vmem:[#allocation5 + $0x140] sm:$0xff] }
  0x46   :  { %738 = vmatprep.subr.bf16.mxu1 %v737_v43  ;;  %v108_v61 = vld [vmem:[#allocation5 + $0x178] sm:$0xff]  ;;  %v681_v0 = vpack.c.bf16 %v106_v59, %v102_v58  ;;  %v105_v2 = vld [vmem:[#allocation5 + $0x160] sm:$0xff]  ;;  %v103_v3 = vld [vmem:[#allocation5 + $0x150] sm:$0xff]  ;;  %v1029_v59 = vshrl.u32 %v191_v46, 7 }
  0x47   :  { %v745_v4 = vpack.c.bf16 %v108_v61, %v104_v60  ;;  %v107_v5 = vld [vmem:[#allocation5 + $0x170] sm:$0xff]  ;;  %v110_v6 = vld [vmem:[#allocation5 + $0x188] sm:$0xff]  ;;  %v112_v8 = vld [vmem:[#allocation5 + $0x198] sm:$0xff]  ;;  %v683_v10 = vpack.c.bf16 %v105_v2, %v101_v1 }
  0x48   :  { %676 = vmatpush1.bf16.msra.mxu0 %v675_v50  ;;  %v114_v7 = vld [vmem:[#allocation5 + $0x1a8] sm:$0xff]  ;;  %v116_v9 = vld [vmem:[#allocation5 + $0x1b8] sm:$0xff]  ;;  %v747_v11 = vpack.c.bf16 %v107_v5, %v103_v3  ;;  %v109_v13 = vld [vmem:[#allocation5 + $0x180] sm:$0xff] }
  0x49   :  { %740 = vmatpush1.bf16.msra.mxu1 %v739_v51  ;;  %678 = vmatprep.subr.bf16.mxu0 %v677_v52  ;;  %v685_v12 = vpack.c.bf16 %v114_v7, %v110_v6  ;;  %v113_v14 = vld [vmem:[#allocation5 + $0x1a0] sm:$0xff]  ;;  %v111_v15 = vld [vmem:[#allocation5 + $0x190] sm:$0xff]  ;;  %v749_v16 = vpack.c.bf16 %v116_v9, %v112_v8  ;;  %v118_v18 = vld [vmem:[#allocation5 + $0x1c8] sm:$0xff]  ;;  %v197_v8 = vsub.s32 1, %v1029_v59 }
  0x4a   :  { %742 = vmatprep.subr.bf16.mxu1 %v741_v56  ;;  %v115_v17 = vld [vmem:[#allocation5 + $0x1b0] sm:$0xff]  ;;  %v122_v19 = vld [vmem:[#allocation5 + $0x1e8] sm:$0xff]  ;;  %v120_v20 = vld [vmem:[#allocation5 + $0x1d8] sm:$0xff]  ;;  %v687_v22 = vpack.c.bf16 %v113_v14, %v109_v13 }
  0x4b   :  { %v124_v21 = vld [vmem:[#allocation5 + $0x1f8] sm:$0xff]  ;;  %v751_v23 = vpack.c.bf16 %v115_v17, %v111_v15  ;;  %v689_v24 = vpack.c.bf16 %v122_v19, %v118_v18  ;;  %v117_v25 = vld [vmem:[#allocation5 + $0x1c0] sm:$0xff]  ;;  %v119_v27 = vld [vmem:[#allocation5 + $0x1d0] sm:$0xff] }
  0x4c   :  { %680 = vmatpush1.bf16.msra.mxu0 %v679_v62  ;;  %v121_v26 = vld [vmem:[#allocation5 + $0x1e0] sm:$0xff]  ;;  %v753_v28 = vpack.c.bf16 %v124_v21, %v120_v20  ;;  %v123_v29 = vld [vmem:[#allocation5 + $0x1f0] sm:$0xff]  ;;  %v126_v30 = vld [vmem:[#allocation5 + $0x208] sm:$0xff] }
  0x4d   :  { %744 = vmatpush1.bf16.msra.mxu1 %v743_v63  ;;  %682 = vmatprep.subr.bf16.mxu0 %v681_v0  ;;  %v130_v31 = vld [vmem:[#allocation5 + $0x228] sm:$0xff]  ;;  %v128_v32 = vld [vmem:[#allocation5 + $0x218] sm:$0xff]  ;;  %v691_v34 = vpack.c.bf16 %v121_v26, %v117_v25  ;;  %v755_v35 = vpack.c.bf16 %v123_v29, %v119_v27  ;;  %v125_v37 = vld [vmem:[#allocation5 + $0x200] sm:$0xff] }
  0x4e   :  { %746 = vmatprep.subr.bf16.mxu1 %v745_v4  ;;  %v132_v33 = vld [vmem:[#allocation5 + $0x238] sm:$0xff]  ;;  %v693_v36 = vpack.c.bf16 %v130_v31, %v126_v30  ;;  %v129_v38 = vld [vmem:[#allocation5 + $0x220] sm:$0xff]  ;;  %v127_v39 = vld [vmem:[#allocation5 + $0x210] sm:$0xff] }
  0x4f   :  { %v757_v40 = vpack.c.bf16 %v132_v33, %v128_v32  ;;  %v131_v41 = vld [vmem:[#allocation5 + $0x230] sm:$0xff]  ;;  %v134_v42 = vld [vmem:[#allocation5 + $0x248] sm:$0xff]  ;;  %v136_v44 = vld [vmem:[#allocation5 + $0x258] sm:$0xff]  ;;  %v695_v47 = vpack.c.bf16 %v129_v38, %v125_v37 }
  0x50   :  { %684 = vmatpush1.bf16.msra.mxu0 %v683_v10  ;;  %v138_v43 = vld [vmem:[#allocation5 + $0x268] sm:$0xff]  ;;  %v140_v45 = vld [vmem:[#allocation5 + $0x278] sm:$0xff]  ;;  %v759_v48 = vpack.c.bf16 %v131_v41, %v127_v39  ;;  %v133_v50 = vld [vmem:[#allocation5 + $0x240] sm:$0xff] }
  0x51   :  { %748 = vmatpush1.bf16.msra.mxu1 %v747_v11  ;;  %686 = vmatprep.subr.bf16.mxu0 %v685_v12  ;;  %v697_v49 = vpack.c.bf16 %v138_v43, %v134_v42  ;;  %v137_v51 = vld [vmem:[#allocation5 + $0x260] sm:$0xff]  ;;  %v135_v52 = vld [vmem:[#allocation5 + $0x250] sm:$0xff]  ;;  %v761_v53 = vpack.c.bf16 %v140_v45, %v136_v44  ;;  %v142_v55 = vld [vmem:[#allocation5 + $0x288] sm:$0xff] }
  0x52   :  { %750 = vmatprep.subr.bf16.mxu1 %v749_v16  ;;  %v139_v54 = vld [vmem:[#allocation5 + $0x270] sm:$0xff]  ;;  %v146_v56 = vld [vmem:[#allocation5 + $0x2a8] sm:$0xff]  ;;  %v144_v57 = vld [vmem:[#allocation5 + $0x298] sm:$0xff]  ;;  %v699_v60 = vpack.c.bf16 %v137_v51, %v133_v50 }
  0x53   :  { %v148_v58 = vld [vmem:[#allocation5 + $0x2b8] sm:$0xff]  ;;  %v763_v61 = vpack.c.bf16 %v139_v54, %v135_v52  ;;  %v701_v62 = vpack.c.bf16 %v146_v56, %v142_v55  ;;  %v141_v63 = vld [vmem:[#allocation5 + $0x280] sm:$0xff]  ;;  %v143_v1 = vld [vmem:[#allocation5 + $0x290] sm:$0xff] }
  0x54   :  { %688 = vmatpush1.bf16.msra.mxu0 %v687_v22  ;;  %v145_v0 = vld [vmem:[#allocation5 + $0x2a0] sm:$0xff]  ;;  %v765_v2 = vpack.c.bf16 %v148_v58, %v144_v57  ;;  %v147_v3 = vld [vmem:[#allocation5 + $0x2b0] sm:$0xff]  ;;  %v150_v4 = vld [vmem:[#allocation5 + $0x2c8] sm:$0xff] }
  0x55   :  { %752 = vmatpush1.bf16.msra.mxu1 %v751_v23  ;;  %690 = vmatprep.subr.bf16.mxu0 %v689_v24  ;;  %v154_v5 = vld [vmem:[#allocation5 + $0x2e8] sm:$0xff]  ;;  %v152_v6 = vld [vmem:[#allocation5 + $0x2d8] sm:$0xff]  ;;  %v703_v9 = vpack.c.bf16 %v145_v0, %v141_v63  ;;  %v149_v10 = vld [vmem:[#allocation5 + $0x2c0] sm:$0xff]  ;;  %v767_v11 = vpack.c.bf16 %v147_v3, %v143_v1 }
  0x56   :  { %754 = vmatprep.subr.bf16.mxu1 %v753_v28  ;;  %v156_v7 = vld [vmem:[#allocation5 + $0x2f8] sm:$0xff]  ;;  %v705_v12 = vpack.c.bf16 %v154_v5, %v150_v4  ;;  %v153_v13 = vld [vmem:[#allocation5 + $0x2e0] sm:$0xff]  ;;  %v151_v14 = vld [vmem:[#allocation5 + $0x2d0] sm:$0xff] }
  0x57   :  { %v155_v15 = vld [vmem:[#allocation5 + $0x2f0] sm:$0xff]  ;;  %v769_v16 = vpack.c.bf16 %v156_v7, %v152_v6  ;;  %v158_v17 = vld [vmem:[#allocation5 + $0x308] sm:$0xff]  ;;  %v1032_v19 = vld [vmem:[#allocation2] sm:$0x3]  ;;  %v707_v23 = vpack.c.bf16 %v153_v13, %v149_v10  ;;  %v193_v6 = vsub.s32 0, %v1029_v59 }
  0x58   :  { %692 = vmatpush1.bf16.msra.mxu0 %v691_v34  ;;  %v162_v18 = vld [vmem:[#allocation5 + $0x328] sm:$0xff]  ;;  %v160_v20 = vld [vmem:[#allocation5 + $0x318] sm:$0xff]  ;;  %v198_v22 = vrot.slane %v1032_v19, %v197_v8  ;;  %v771_v24 = vpack.c.bf16 %v155_v15, %v151_v14  ;;  %v157_v26 = vld [vmem:[#allocation5 + $0x300] sm:$0xff] }
  0x59   :  { %756 = vmatpush1.bf16.msra.mxu1 %v755_v35  ;;  %694 = vmatprep.subr.bf16.mxu0 %v693_v36  ;;  %v164_v21 = vld [vmem:[#allocation5 + $0x338] sm:$0xff]  ;;  %v709_v25 = vpack.c.bf16 %v162_v18, %v158_v17  ;;  %v161_v27 = vld [vmem:[#allocation5 + $0x320] sm:$0xff]  ;;  %v159_v28 = vld [vmem:[#allocation5 + $0x310] sm:$0xff] }
  0x5a   :  { %758 = vmatprep.subr.bf16.mxu1 %v757_v40  ;;  %v773_v29 = vpack.c.bf16 %v164_v21, %v160_v20  ;;  %v163_v30 = vld [vmem:[#allocation5 + $0x330] sm:$0xff]  ;;  %v166_v31 = vld [vmem:[#allocation5 + $0x348] sm:$0xff]  ;;  %286 = vmatprep.mubr.f32.mxu0 %v198_v22  ;;  %v168_v33 = vld [vmem:[#allocation5 + $0x358] sm:$0xff]  ;;  %v711_v35 = vpack.c.bf16 %v161_v27, %v157_v26  ;;  %v194_v21 = vrot.slane %v1032_v19, %v193_v6 }
  0x5b   :  { %v170_v32 = vld [vmem:[#allocation5 + $0x368] sm:$0xff]  ;;  %v172_v34 = vld [vmem:[#allocation5 + $0x378] sm:$0xff]  ;;  %357 = vmatprep.mubr.f32.mxu1 %v198_v22  ;;  %v775_v36 = vpack.c.bf16 %v163_v30, %v159_v28  ;;  %v165_v38 = vld [vmem:[#allocation5 + $0x340] sm:$0xff] }
  0x5c   :  { %696 = vmatpush1.bf16.msra.mxu0 %v695_v47  ;;  %v713_v37 = vpack.c.bf16 %v170_v32, %v166_v31  ;;  %v169_v39 = vld [vmem:[#allocation5 + $0x360] sm:$0xff]  ;;  %v167_v40 = vld [vmem:[#allocation5 + $0x350] sm:$0xff]  ;;  %v777_v41 = vpack.c.bf16 %v172_v34, %v168_v33  ;;  %v174_v43 = vld [vmem:[#allocation5 + $0x388] sm:$0xff] }
  0x5d   :  { %760 = vmatpush1.bf16.msra.mxu1 %v759_v48  ;;  %698 = vmatprep.subr.bf16.mxu0 %v697_v49  ;;  %v171_v42 = vld [vmem:[#allocation5 + $0x370] sm:$0xff]  ;;  %v178_v44 = vld [vmem:[#allocation5 + $0x3a8] sm:$0xff]  ;;  %v176_v45 = vld [vmem:[#allocation5 + $0x398] sm:$0xff]  ;;  %v715_v47 = vpack.c.bf16 %v169_v39, %v165_v38 }
  0x5e   :  { %762 = vmatprep.subr.bf16.mxu1 %v761_v53  ;;  %v180_v46 = vld [vmem:[#allocation5 + $0x3b8] sm:$0xff]  ;;  %v779_v48 = vpack.c.bf16 %v171_v42, %v167_v40  ;;  %v717_v49 = vpack.c.bf16 %v178_v44, %v174_v43  ;;  %v173_v50 = vld [vmem:[#allocation5 + $0x380] sm:$0xff]  ;;  %v175_v52 = vld [vmem:[#allocation5 + $0x390] sm:$0xff] }
  0x5f   :  { %v177_v51 = vld [vmem:[#allocation5 + $0x3a0] sm:$0xff]  ;;  %v781_v53 = vpack.c.bf16 %v180_v46, %v176_v45  ;;  %v179_v54 = vld [vmem:[#allocation5 + $0x3b0] sm:$0xff]  ;;  %v182_v55 = vld [vmem:[#allocation5 + $0x3c8] sm:$0xff] }
  0x60   :  { %700 = vmatpush1.bf16.msra.mxu0 %v699_v60  ;;  %v186_v56 = vld [vmem:[#allocation5 + $0x3e8] sm:$0xff]  ;;  %v184_v57 = vld [vmem:[#allocation5 + $0x3d8] sm:$0xff]  ;;  %v719_v60 = vpack.c.bf16 %v177_v51, %v173_v50  ;;  %v181_v63 = vld [vmem:[#allocation5 + $0x3c0] sm:$0xff] }
  0x61   :  { %764 = vmatpush1.bf16.msra.mxu1 %v763_v61  ;;  %702 = vmatprep.subr.bf16.mxu0 %v701_v62  ;;  %v188_v58 = vld [vmem:[#allocation5 + $0x3f8] sm:$0xff]  ;;  %v783_v61 = vpack.c.bf16 %v179_v54, %v175_v52  ;;  %v721_v62 = vpack.c.bf16 %v186_v56, %v182_v55  ;;  %v185_v0 = vld [vmem:[#allocation5 + $0x3e0] sm:$0xff]  ;;  %v183_v1 = vld [vmem:[#allocation5 + $0x3d0] sm:$0xff] }
  0x62   :  { %766 = vmatprep.subr.bf16.mxu1 %v765_v2  ;;  %v785_v2 = vpack.c.bf16 %v188_v58, %v184_v57  ;;  %v187_v3 = vld [vmem:[#allocation5 + $0x3f0] sm:$0xff]  ;;  %v384_v4 = vld [vmem:[#allocation7 + $0x80] sm:$0xff]  ;;  %v385_v5 = vld [vmem:[#allocation7 + $0x88] sm:$0xff]  ;;  %v723_v10 = vpack.c.bf16 %v185_v0, %v181_v63 }
  0x63   :  { %v416_v7 = vld [vmem:[#allocation7 + $0x180] sm:$0xff]  ;;  %v369_v14 = vld [vmem:[#allocation7 + $0x8] sm:$0xff]  ;;  %v386_v18 = vld [vmem:[#allocation7 + $0x90] sm:$0xff] }
  0x64   :  { %704 = vmatpush1.bf16.msra.mxu0 %v703_v9  ;;  %v417_v9 = vld [vmem:[#allocation7 + $0x188] sm:$0xff]  ;;  %v368_v13 = vld [vmem:[#allocation7] sm:$0xff]  ;;  %v387_v20 = vld [vmem:[#allocation7 + $0x98] sm:$0xff] }
  0x65   :  { %768 = vmatpush1.bf16.msra.mxu1 %v767_v11  ;;  %706 = vmatprep.subr.bf16.mxu0 %v705_v12  ;;  %v787_v11 = vpack.c.bf16 %v187_v3, %v183_v1  ;;  %v789_v12 = vpack.c.bf16 %v385_v5, %v384_v4  ;;  %v400_v15 = vld [vmem:[#allocation7 + $0x100] sm:$0xff]  ;;  %v401_v17 = vld [vmem:[#allocation7 + $0x108] sm:$0xff]  ;;  %v418_v22 = vld [vmem:[#allocation7 + $0x190] sm:$0xff]  ;;  %v793_v26 = vpack.c.bf16 %v387_v20, %v386_v18 }
  0x66   :  { %770 = vmatprep.subr.bf16.mxu1 %v769_v16  ;;  %v821_v16 = vpack.c.bf16 %v417_v9, %v416_v7  ;;  %v370_v27 = vld [vmem:[#allocation7 + $0x10] sm:$0xff]  ;;  %v371_v28 = vld [vmem:[#allocation7 + $0x18] sm:$0xff]  ;;  %v388_v32 = vld [vmem:[#allocation7 + $0xa0] sm:$0xff] }
  0x67   :  { %v403_v31 = vld [vmem:[#allocation7 + $0x118] sm:$0xff]  ;;  %v389_v33 = vld [vmem:[#allocation7 + $0xa8] sm:$0xff]  ;;  %v420_v34 = vld [vmem:[#allocation7 + $0x1a0] sm:$0xff]  ;;  %v795_v19 = vpack.c.bf16 %v371_v28, %v370_v27 }
  0x68   :  { %708 = vmatpush1.bf16.msra.mxu0 %v707_v23  ;;  %v419_v23 = vld [vmem:[#allocation7 + $0x198] sm:$0xff]  ;;  %v372_v38 = vld [vmem:[#allocation7 + $0x20] sm:$0xff]  ;;  %v373_v39 = vld [vmem:[#allocation7 + $0x28] sm:$0xff] }
  0x69   :  { %772 = vmatpush1.bf16.msra.mxu1 %v771_v24  ;;  %710 = vmatprep.subr.bf16.mxu0 %v709_v25  ;;  %v791_v24 = vpack.c.bf16 %v369_v14, %v368_v13  ;;  %v823_v25 = vpack.c.bf16 %v401_v17, %v400_v15  ;;  %v825_v30 = vpack.c.bf16 %v419_v23, %v418_v22  ;;  %v404_v40 = vld [vmem:[#allocation7 + $0x120] sm:$0xff]  ;;  %v405_v42 = vld [vmem:[#allocation7 + $0x128] sm:$0xff]  ;;  %v390_v43 = vld [vmem:[#allocation7 + $0xb0] sm:$0xff] }
  0x6a   :  { %774 = vmatprep.subr.bf16.mxu1 %v773_v29  ;;  %v402_v29 = vld [vmem:[#allocation7 + $0x110] sm:$0xff]  ;;  %v391_v44 = vld [vmem:[#allocation7 + $0xb8] sm:$0xff]  ;;  %v392_v55 = vld [vmem:[#allocation7 + $0xc0] sm:$0xff] }
  0x6b   :  { %v422_v45 = vld [vmem:[#allocation7 + $0x1b0] sm:$0xff]  ;;  %v423_v46 = vld [vmem:[#allocation7 + $0x1b8] sm:$0xff]  ;;  %v393_v56 = vld [vmem:[#allocation7 + $0xc8] sm:$0xff] }
  0x6c   :  { %712 = vmatpush1.bf16.msra.mxu0 %v711_v35  ;;  %v421_v35 = vld [vmem:[#allocation7 + $0x1a8] sm:$0xff]  ;;  %v374_v50 = vld [vmem:[#allocation7 + $0x30] sm:$0xff]  ;;  %v375_v51 = vld [vmem:[#allocation7 + $0x38] sm:$0xff] }
  0x6d   :  { %776 = vmatpush1.bf16.msra.mxu1 %v775_v36  ;;  %714 = vmatprep.subr.bf16.mxu0 %v713_v37  ;;  %v827_v36 = vpack.c.bf16 %v403_v31, %v402_v29  ;;  %v797_v37 = vpack.c.bf16 %v389_v33, %v388_v32  ;;  %v406_v52 = vld [vmem:[#allocation7 + $0x130] sm:$0xff]  ;;  %v407_v54 = vld [vmem:[#allocation7 + $0x138] sm:$0xff]  ;;  %v424_v57 = vld [vmem:[#allocation7 + $0x1c0] sm:$0xff] }
  0x6e   :  { %778 = vmatprep.subr.bf16.mxu1 %v777_v41  ;;  %v829_v41 = vpack.c.bf16 %v421_v35, %v420_v34  ;;  %v425_v58 = vld [vmem:[#allocation7 + $0x1c8] sm:$0xff]  ;;  %v376_v63 = vld [vmem:[#allocation7 + $0x40] sm:$0xff]  ;;  %v394_v4 = vld [vmem:[#allocation7 + $0xd0] sm:$0xff] }
  0x6f   :  { %v377_v0 = vld [vmem:[#allocation7 + $0x48] sm:$0xff]  ;;  %v408_v1 = vld [vmem:[#allocation7 + $0x140] sm:$0xff]  ;;  %v395_v5 = vld [vmem:[#allocation7 + $0xd8] sm:$0xff] }
  0x70   :  { %716 = vmatpush1.bf16.msra.mxu0 %v715_v47  ;;  %v799_v47 = vpack.c.bf16 %v373_v39, %v372_v38  ;;  %v409_v3 = vld [vmem:[#allocation7 + $0x148] sm:$0xff]  ;;  %v426_v7 = vld [vmem:[#allocation7 + $0x1d0] sm:$0xff]  ;;  %v427_v9 = vld [vmem:[#allocation7 + $0x1d8] sm:$0xff] }
  0x71   :  { %780 = vmatpush1.bf16.msra.mxu1 %v779_v48  ;;  %718 = vmatprep.subr.bf16.mxu0 %v717_v49  ;;  %v831_v48 = vpack.c.bf16 %v405_v42, %v404_v40  ;;  %v801_v49 = vpack.c.bf16 %v391_v44, %v390_v43  ;;  %v378_v13 = vld [vmem:[#allocation7 + $0x50] sm:$0xff]  ;;  %v379_v14 = vld [vmem:[#allocation7 + $0x58] sm:$0xff]  ;;  %v396_v18 = vld [vmem:[#allocation7 + $0xe0] sm:$0xff] }
  0x72   :  { %782 = vmatprep.subr.bf16.mxu1 %v781_v53  ;;  %v833_v53 = vpack.c.bf16 %v423_v46, %v422_v45  ;;  %v410_v15 = vld [vmem:[#allocation7 + $0x150] sm:$0xff]  ;;  %v411_v17 = vld [vmem:[#allocation7 + $0x158] sm:$0xff]  ;;  %v397_v20 = vld [vmem:[#allocation7 + $0xe8] sm:$0xff]  ;;  %v811_v23 = vpack.c.bf16 %v379_v14, %v378_v13  ;;  %v212_v45 = vsub.s32 2, %v1029_v59  ;;  %v216_v46 = vsub.s32 3, %v1029_v59 }
  0x73   :  { %v429_v22 = vld [vmem:[#allocation7 + $0x1e8] sm:$0xff]  ;;  %v380_v27 = vld [vmem:[#allocation7 + $0x60] sm:$0xff]  ;;  %v398_v33 = vld [vmem:[#allocation7 + $0xf0] sm:$0xff] }
  0x74   :  { %720 = vmatpush1.bf16.msra.mxu0 %v719_v60  ;;  %v803_v60 = vpack.c.bf16 %v375_v51, %v374_v50  ;;  %v381_v28 = vld [vmem:[#allocation7 + $0x68] sm:$0xff]  ;;  %v412_v29 = vld [vmem:[#allocation7 + $0x160] sm:$0xff]  ;;  %v399_v34 = vld [vmem:[#allocation7 + $0xf8] sm:$0xff] }
  0x75   :  { %784 = vmatpush1.bf16.msra.mxu1 %v783_v61  ;;  %722 = vmatprep.subr.bf16.mxu0 %v721_v62  ;;  %v835_v61 = vpack.c.bf16 %v407_v54, %v406_v52  ;;  %v805_v62 = vpack.c.bf16 %v393_v56, %v392_v55  ;;  %v413_v31 = vld [vmem:[#allocation7 + $0x168] sm:$0xff]  ;;  %v430_v35 = vld [vmem:[#allocation7 + $0x1f0] sm:$0xff]  ;;  %v383_v38 = vld [vmem:[#allocation7 + $0x78] sm:$0xff] }
  0x76   :  { %786 = vmatprep.subr.bf16.mxu1 %v785_v2  ;;  %v837_v2 = vpack.c.bf16 %v425_v58, %v424_v57  ;;  %v847_v32 = vpack.c.bf16 %v413_v31, %v412_v29  ;;  %v415_v42 = vld [vmem:[#allocation7 + $0x178] sm:$0xff] }
  0x77   :  { %v189_v44 = vld [vmem:[%s1067_s2] sm:$0xf] }
  0x78   :  { %724 = vmatpush1.bf16.msra.mxu0 %v723_v10  ;;  %v807_v10 = vpack.c.bf16 %v377_v0, %v376_v63  ;;  %v217_v50 = vrot.slane %v189_v44, %v216_v46 }
  0x79   :  { %788 = vmatpush1.bf16.msra.mxu1 %v787_v11  ;;  %790 = vmatprep.subr.bf16.mxu0 %v789_v12  ;;  %v839_v11 = vpack.c.bf16 %v409_v3, %v408_v1  ;;  %v809_v12 = vpack.c.bf16 %v395_v5, %v394_v4 }
  0x7a   :  { %822 = vmatprep.subr.bf16.mxu1 %v821_v16  ;;  %v841_v16 = vpack.c.bf16 %v427_v9, %v426_v7 }
  0x7b   :  { %287 = vmatmul.mubr.f32.vlgmr.msra.gmra.mrb[0].mxu0 %v194_v21 }
  0x7c   :  { %358 = vmatmul.mubr.f32.vlgmr.msra.gmra.mrb[0].mxu1 %v194_v21  ;;  %792 = vmatpush3.bf16.msra.mxu0 %v791_v24  ;;  %v428_v21 = vld [vmem:[#allocation7 + $0x1e0] sm:$0xff]  ;;  %v843_v24 = vpack.c.bf16 %v411_v17, %v410_v15 }
  0x7d   :  { %824 = vmatpush3.bf16.msra.mxu1 %v823_v25  ;;  %794 = vmatprep.subr.bf16.mxu0 %v793_v26  ;;  %v813_v25 = vpack.c.bf16 %v397_v20, %v396_v18  ;;  %v845_v26 = vpack.c.bf16 %v429_v22, %v428_v21 }
  0x7e   :  { %826 = vmatprep.subr.bf16.mxu1 %v825_v30  ;;  %v815_v30 = vpack.c.bf16 %v381_v28, %v380_v27 }
  0x80   :  { %796 = vmatpush3.bf16.msra.mxu0 %v795_v19  ;;  %v817_v19 = vpack.c.bf16 %v399_v34, %v398_v33 }
  0x81   :  { %828 = vmatpush3.bf16.msra.mxu1 %v827_v36  ;;  %798 = vmatprep.subr.bf16.mxu0 %v797_v37  ;;  %v431_v36 = vld [vmem:[#allocation7 + $0x1f8] sm:$0xff]  ;;  %v382_v37 = vld [vmem:[#allocation7 + $0x70] sm:$0xff] }
  0x82   :  { %830 = vmatprep.subr.bf16.mxu1 %v829_v41  ;;  %v849_v39 = vpack.c.bf16 %v431_v36, %v430_v35  ;;  %v819_v40 = vpack.c.bf16 %v383_v38, %v382_v37  ;;  %v414_v41 = vld [vmem:[#allocation7 + $0x170] sm:$0xff] }
  0x83   :  { %v851_v43 = vpack.c.bf16 %v415_v42, %v414_v41 }
  0x84   :  { %800 = vmatpush3.bf16.msra.mxu0 %v799_v47  ;;  %v205_v47 = vrot.slane %v189_v44, %v193_v6 }
  0x85   :  { %832 = vmatpush3.bf16.msra.mxu1 %v831_v48  ;;  %802 = vmatprep.subr.bf16.mxu0 %v801_v49  ;;  %v213_v48 = vrot.slane %v189_v44, %v212_v45  ;;  %v209_v49 = vrot.slane %v189_v44, %v197_v8  ;;  %v432_v8 = vld [vmem:[%s1069_s4] sm:$0x1] }
  0x86   :  { %834 = vmatprep.subr.bf16.mxu1 %v833_v53 }
  0x88   :  { %804 = vmatpush3.bf16.msra.mxu0 %v803_v60 }
  0x89   :  { %836 = vmatpush3.bf16.msra.mxu1 %v835_v61  ;;  %806 = vmatprep.subr.bf16.mxu0 %v805_v62 }
  0x8a   :  { %838 = vmatprep.subr.bf16.mxu1 %v837_v2 }
  0x8c   :  { %808 = vmatpush3.bf16.msra.mxu0 %v807_v10 }
  0x8d   :  { %840 = vmatpush3.bf16.msra.mxu1 %v839_v11  ;;  %810 = vmatprep.subr.bf16.mxu0 %v809_v12 }
  0x8e   :  { %842 = vmatprep.subr.bf16.mxu1 %v841_v16 }
  0x90   :  { %812 = vmatpush3.bf16.msra.mxu0 %v811_v23 }
  0x91   :  { %844 = vmatpush3.bf16.msra.mxu1 %v843_v24  ;;  %814 = vmatprep.subr.bf16.mxu0 %v813_v25 }
  0x92   :  { %846 = vmatprep.subr.bf16.mxu1 %v845_v26 }
  0x94   :  { %816 = vmatpush3.bf16.msra.mxu0 %v815_v30 }
  0x95   :  { %848 = vmatpush3.bf16.msra.mxu1 %v847_v32  ;;  %818 = vmatprep.subr.bf16.mxu0 %v817_v19 }
  0x96   :  { %850 = vmatprep.subr.bf16.mxu1 %v849_v39 }
  0x98   :  { %820 = vmatpush3.bf16.msra.mxu0 %v819_v40 }
  0x99   :  { %852 = vmatpush3.bf16.msra.mxu1 %v851_v43 }
 0x14e   :  { %v288_v51 = vpop.f32.mrb[0].mxu0 }
 0x14f   :  { %v289_v52 = vadd.f32 %v288_v51, %v205_v47  ;;  %v359_v53 = vpop.f32.mrb[0].mxu1  ;;  %v290_v54 = vpop.f32.mrb[1].mxu0 }
 0x150   :  { %v360_v55 = vadd.f32 %v359_v53, %v213_v48  ;;  %v291_v56 = vadd.f32 %v290_v54, %v209_v49  ;;  %v361_v57 = vpop.f32.mrb[1].mxu1 }
 0x151   :  { %v362_v58 = vadd.f32 %v361_v57, %v217_v50  ;;  %v364_v62 = vmax.f32 %v289_v52, 0.0 }
 0x152   :  { %v366_v60 = vmax.f32 %v360_v55, 0.0  ;;  %v365_v61 = vmax.f32 %v291_v56, 0.0 }
 0x153   :  { %v367_v63 = vmax.f32 %v362_v58, 0.0 }
 0x154   :  { %497 = vmatprep.mubr.f32.mxu0 %v365_v61 }
 0x155   :  { %567 = vmatprep.mubr.f32.mxu1 %v367_v63  ;;  %498 = vmatmul.mubr.f32.vlgmr.msra.gmra.mrb[2].mxu0 %v364_v62 }
 0x156   :  { %568 = vmatmul.mubr.f32.vlgmr.msra.gmra.mrb[2].mxu1 %v366_v60 }
 0x228   :  { %v623_v6 = vpop.f32.mrb[2].mxu0 }
 0x229   :  { %v658_v59 = vpop.f32.mrb[2].mxu1  ;;  %v624_v0 = vpop.f32.mrb[3].mxu0 }
 0x22a   :  { %v625_v1 = vadd.f32 %v624_v0, %v623_v6  ;;  %v659_v2 = vpop.f32.mrb[3].mxu1 }
 0x22b   :  { %v660_v3 = vadd.f32 %v659_v2, %v658_v59 }
 0x22c   :  { %v500_v4 = vadd.f32 %v625_v1, %v432_v8 }
 0x22e   :  { %v570_v5 = vadd.f32 %v660_v3, %v500_v4 }
 0x230   :  { %v573_v7 = vmax.f32 %v570_v5, 0.0 }
 0x232   :  { %574 = vst [vmem:[#allocation8] sm:$0x1] %v573_v7 }
 0x233   :  { %938 = shalt.err (!%p935_p0)
}
 0x234   :  { %s939_s13 = scalar_lea.hbm %s1070_s5, 16 }
 0x235   :  { %p940_p1 = scmp.ne.s32.totalorder %s1070_s5, %s939_s13  ;;  %p943_p2 = scmp.lt.u32.totalorder %s939_s13, %s1070_s5 }
 0x237   :  { %p945_p3 = pnand %p943_p2, %p940_p1 }
 0x239   :  { %948 = shalt.err (!%p945_p3)
}
 0x23a   :  { %584 = dma.vmem_to_hbm [thread:$0]  %s582_s9, 16, %s1070_s5, [#allocation4]  }
 0x23b   :  { %953 = dma.done.wait [#allocation4], 16  }
 0x23c   :  { %954 = vsyncadd [#allocation4], 4294967280 }
 0x23d   :  { %588 = vsyncpa [#allocation3], 1 }
 0x23e   :  { %589 = vsyncpa [#allocation6], 1 }
 0x23f   :  { %590 = vsyncpa [#allocation4], 1 }

</bundles_post_ra>
